<compile_context>
chip_gen: v6e
topology: v6e:2x2x1
jax: 0.10.0
libtpu: 0.0.40
codegen_flags: <defaults>
</compile_context>

<pallas_src>
import jax
import jax.numpy as jnp
import numpy as np
from jax import lax
from jax.experimental import pallas as pl
from jax.experimental.pallas import tpu as pltpu


def _row_tile(m, target=256):
    """Largest row tile <= target that divides m and is a multiple of 8 (else m itself)."""
    if m <= target:
        return m
    for t in range(target, 7, -1):
        if m % t == 0 and t % 8 == 0:
            return t
    return m


# ----------------------------------------------------------------------------
# 1) Hoisted input projection: out = x @ w + b (one big tiled GEMM)
# ----------------------------------------------------------------------------
def _gemm_bias_kernel(x_ref, w_ref, b_ref, o_ref):
    o_ref[...] = (jnp.dot(x_ref[...], w_ref[...], preferred_element_type=jnp.float32)
                  + b_ref[...])


def gemm_bias_pallas(x, w, b):
    M, K = x.shape
    N = w.shape[1]
    tm = _row_tile(M)
    return pl.pallas_call(
        _gemm_bias_kernel,
        grid_spec=pltpu.PrefetchScalarGridSpec(
            num_scalar_prefetch=0, grid=(M // tm,),
            in_specs=[pl.BlockSpec((tm, K), lambda i: (i, 0)),
                      pl.BlockSpec((K, N), lambda i: (0, 0)),
                      pl.BlockSpec((1, N), lambda i: (0, 0))],
            out_specs=pl.BlockSpec((tm, N), lambda i: (i, 0))),
        out_shape=jax.ShapeDtypeStruct((M, N), jnp.float32),
        compiler_params=pltpu.CompilerParams(dimension_semantics=("parallel",)),
    )(x, w, b)


# ----------------------------------------------------------------------------
# 2) Bidirectional LSTM recurrence (packed-sequence semantics via mask),
#    time-chunked grid, input gates precomputed outside.
# ----------------------------------------------------------------------------
def _bilstm_kernel(gin_f_ref, gin_b_ref, m_f_ref, m_b_ref,
                   whh_f_ref, whh_b_ref,
                   out_f_ref, out_b_ref,
                   h_f, c_f, h_b, c_b):
    @pl.when(pl.program_id(0) == 0)
    def _():
        h_f[...] = jnp.zeros_like(h_f)
        c_f[...] = jnp.zeros_like(c_f)
        h_b[...] = jnp.zeros_like(h_b)
        c_b[...] = jnp.zeros_like(c_b)

    H = h_f.shape[-1]
    C = gin_f_ref.shape[0]
    whh_f = whh_f_ref[...]          # hoist invariant weight reads out of the step loop
    whh_b = whh_b_ref[...]

    def cell(gin, mask, whh, h_ref, c_ref):
        gates = gin + jnp.dot(h_ref[...], whh, preferred_element_type=jnp.float32)  # [B, 4H]
        i_g = jax.nn.sigmoid(gates[:, 0:H])            # PyTorch gate order: i, f, g, o
        f_g = jax.nn.sigmoid(gates[:, H:2 * H])
        g_g = jnp.tanh(gates[:, 2 * H:3 * H])
        o_g = jax.nn.sigmoid(gates[:, 3 * H:4 * H])
        c_new = f_g * c_ref[...] + i_g * g_g
        h_new = o_g * jnp.tanh(c_new)
        keep = mask > 0.0                              # [B, 1]
        c_ref[...] = jnp.where(keep, c_new, c_ref[...])
        h_ref[...] = jnp.where(keep, h_new, h_ref[...])
        return h_ref[...] * mask                       # padded steps -> 0 (pad_packed)

    def step(j, carry):
        out_f_ref[j] = cell(gin_f_ref[j], m_f_ref[j], whh_f, h_f, c_f)
        jr = C - 1 - j                                 # backward dir: reversed within chunk
        out_b_ref[jr] = cell(gin_b_ref[jr], m_b_ref[jr], whh_b, h_b, c_b)
        return carry

    lax.fori_loop(0, C, step, 0, unroll=True)


def bilstm_pallas(gin_f, gin_b, mask, whh_f, whh_b, time_chunk=4):
    T, B, G = gin_f.shape            # G = 4H
    H = whh_f.shape[0]
    C = max(1, min(time_chunk, T))
    while T % C != 0:                # chunk must divide T
        C -= 1
    Tc = T // C
    in_specs = [
        pl.BlockSpec((C, B, G), lambda i: (i, 0, 0)),             # gates fwd, time order
        pl.BlockSpec((C, B, G), lambda i: (Tc - 1 - i, 0, 0)),    # gates bwd, reversed chunks
        pl.BlockSpec((C, B, 1), lambda i: (i, 0, 0)),             # mask fwd
        pl.BlockSpec((C, B, 1), lambda i: (Tc - 1 - i, 0, 0)),    # mask bwd (tiny stream)
        pl.BlockSpec((H, G), lambda i: (0, 0)),
        pl.BlockSpec((H, G), lambda i: (0, 0)),
    ]
    out_specs = [
        pl.BlockSpec((C, B, H), lambda i: (i, 0, 0)),
        pl.BlockSpec((C, B, H), lambda i: (Tc - 1 - i, 0, 0)),
    ]
    out_shape = [jax.ShapeDtypeStruct((T, B, H), jnp.float32),
                 jax.ShapeDtypeStruct((T, B, H), jnp.float32)]
    out_f, out_b = pl.pallas_call(
        _bilstm_kernel,
        grid_spec=pltpu.PrefetchScalarGridSpec(
            num_scalar_prefetch=0, grid=(Tc,),
            in_specs=in_specs, out_specs=out_specs,
            scratch_shapes=[pltpu.VMEM((B, H), jnp.float32)] * 4),
        out_shape=out_shape,
        compiler_params=pltpu.CompilerParams(dimension_semantics=("arbitrary",)),
    )(gin_f, gin_b, mask, mask, whh_f, whh_b)
    return out_f, out_b


# ----------------------------------------------------------------------------
# 3) Hoisted attention MLP: s = tanh(out @ w1 + b1) @ w2 + b2 over flattened B*T rows
# ----------------------------------------------------------------------------
def _mlp_scores_kernel(o_ref, w1_ref, b1_ref, w2_ref, b2_ref, s_ref):
    h1 = jnp.tanh(jnp.dot(o_ref[...], w1_ref[...], preferred_element_type=jnp.float32)
                  + b1_ref[...])
    s_ref[...] = (jnp.dot(h1, w2_ref[...], preferred_element_type=jnp.float32)
                  + b2_ref[...])


def mlp_scores_pallas(out_flat, w1, b1, w2, b2):
    M, H2 = out_flat.shape
    A_dim = w1.shape[1]
    hops = w2.shape[1]
    tm = _row_tile(M)
    return pl.pallas_call(
        _mlp_scores_kernel,
        grid_spec=pltpu.PrefetchScalarGridSpec(
            num_scalar_prefetch=0, grid=(M // tm,),
            in_specs=[pl.BlockSpec((tm, H2), lambda i: (i, 0)),
                      pl.BlockSpec((H2, A_dim), lambda i: (0, 0)),
                      pl.BlockSpec((1, A_dim), lambda i: (0, 0)),
                      pl.BlockSpec((A_dim, hops), lambda i: (0, 0)),
                      pl.BlockSpec((1, hops), lambda i: (0, 0))],
            out_specs=pl.BlockSpec((tm, hops), lambda i: (i, 0))),
        out_shape=jax.ShapeDtypeStruct((M, hops), jnp.float32),
        compiler_params=pltpu.CompilerParams(dimension_semantics=("parallel",)),
    )(out_flat, w1, b1, w2, b2)


# ----------------------------------------------------------------------------
# 4) Attention: softmax over T (lane axis), u = A @ out (lane-dense row),
#    per-batch ||A A^T - I||_F^2 partials
# ----------------------------------------------------------------------------
def _attn_kernel(s_ref, out_ref, u_ref, psq_ref):
    s = s_ref[0]                                      # [hops, T]
    o = out_ref[0]                                    # [T, 2H]
    hops = s.shape[0]
    H2 = o.shape[-1]
    m = jnp.max(s, axis=-1, keepdims=True)
    e = jnp.exp(s - m)
    a = e / jnp.sum(e, axis=-1, keepdims=True)        # softmax over T (lane-axis reduce)
    u = jnp.dot(a, o, preferred_element_type=jnp.float32)            # [hops, 2H]
    for h in range(hops):                             # static tiny loop: lane-dense flattened write
        u_ref[0, :, h * H2:(h + 1) * H2] = u[h:h + 1, :]
    pmat = lax.dot_general(a, a, (((1,), (1,)), ((), ())),
                           preferred_element_type=jnp.float32)       # A A^T, [hops, hops]
    row = lax.broadcasted_iota(jnp.int32, (hops, hops), 0)
    col = lax.broadcasted_iota(jnp.int32, (hops, hops), 1)
    d = pmat - jnp.where(row == col, 1.0, 0.0)        # p - matrix_power(p, 0)
    psq_ref[0] = jnp.sum(d * d, keepdims=True)        # per-batch partial (no shared accumulator)


def attention_pallas(s_bht, out_bt):
    B, hops, T = s_bht.shape
    H2 = out_bt.shape[-1]
    u, psq = pl.pallas_call(
        _attn_kernel,
        grid_spec=pltpu.PrefetchScalarGridSpec(
            num_scalar_prefetch=0, grid=(B,),
            in_specs=[pl.BlockSpec((1, hops, T), lambda b: (b, 0, 0)),
                      pl.BlockSpec((1, T, H2), lambda b: (b, 0, 0))],
            out_specs=[pl.BlockSpec((1, 1, hops * H2), lambda b: (b, 0, 0)),
                       pl.BlockSpec((1, 1, 1), lambda b: (b, 0, 0))]),
        out_shape=[jax.ShapeDtypeStruct((B, 1, hops * H2), jnp.float32),
                   jax.ShapeDtypeStruct((B, 1, 1), jnp.float32)],
        compiler_params=pltpu.CompilerParams(dimension_semantics=("parallel",)),
    )(s_bht, out_bt)
    return u[:, 0, :], jnp.sum(psq)


# ----------------------------------------------------------------------------
# Full forward (glue in plain JAX; hot paths above in Pallas)
# ----------------------------------------------------------------------------
def sentence_embedding_encoder_forward(tokens, lengths, params, penalty, hops, time_chunk=4):
    B, T = tokens.shape
    emb = jnp.take(params['embedding'], tokens, axis=0)                 # [B, T, E]
    x = jnp.transpose(emb, (1, 0, 2)).astype(jnp.float32)               # [T, B, E]
    E = x.shape[-1]
    H = params['whh_f'].shape[0]
    mask = (jnp.arange(T)[:, None] < lengths[None, :]).astype(jnp.float32)[:, :, None]  # [T,B,1]

    # Hoisted input projection for both LSTM directions: one [T*B, E] x [E, 8H] GEMM.
    wih_cat = jnp.concatenate([params['wih_f'], params['wih_b']], axis=1)   # [E, 8H]
    b_cat = jnp.concatenate([params['b_f'], params['b_b']], axis=1)         # [1, 8H]
    gin = gemm_bias_pallas(x.reshape(T * B, E), wih_cat, b_cat).reshape(T, B, 8 * H)
    gin_f, gin_b = gin[:, :, :4 * H], gin[:, :, 4 * H:]

    out_f, out_b = bilstm_pallas(gin_f, gin_b, mask,
                                 params['whh_f'], params['whh_b'],
                                 time_chunk=time_chunk)
    out = jnp.concatenate([out_f, out_b], axis=-1)                      # [T, B, 2H]
    out_bt = jnp.transpose(out, (1, 0, 2))                              # [B, T, 2H]

    # Hoisted attention MLP over flattened B*T rows.
    s = mlp_scores_pallas(out_bt.reshape(B * T, 2 * H),
                          params['w1'], params['b1'], params['w2'], params['b2'])  # [B*T, hops]
    s_bht = jnp.transpose(s.reshape(B, T, hops), (0, 2, 1))             # [B, hops, T]

    u_flat, psq = attention_pallas(s_bht, out_bt)                       # [B, hops*2H], scalar
    p = jnp.sqrt(psq) * penalty
    return u_flat, p


# ----------------------------------------------------------------------------
# Pure-JAX reference for verification
# ----------------------------------------------------------------------------
def reference_forward(tokens, lengths, params, penalty, hops):
    emb = jnp.take(params['embedding'], tokens, axis=0)
    B, T, _ = emb.shape
    x = jnp.transpose(emb, (1, 0, 2)).astype(jnp.float32)
    mask = (jnp.arange(T)[:, None] < lengths[None, :]).astype(jnp.float32)[:, :, None]
    H = params['whh_f'].shape[0]

    def cell(wih, whh, b):
        def step(carry, inp):
            h, c = carry
            xt, mt = inp
            g = xt @ wih + h @ whh + b
            i = jax.nn.sigmoid(g[:, :H]); f = jax.nn.sigmoid(g[:, H:2 * H])
            gg = jnp.tanh(g[:, 2 * H:3 * H]); o = jax.nn.sigmoid(g[:, 3 * H:])
            c_new = f * c + i * gg
            h_new = o * jnp.tanh(c_new)
            keep = mt > 0
            c = jnp.where(keep, c_new, c)
            h = jnp.where(keep, h_new, h)
            return (h, c), h * mt
        return step

    init = (jnp.zeros((B, H), jnp.float32), jnp.zeros((B, H), jnp.float32))
    _, out_f = lax.scan(cell(params['wih_f'], params['whh_f'], params['b_f']), init, (x, mask))
    _, out_b_rev = lax.scan(cell(params['wih_b'], params['whh_b'], params['b_b']),
                            init, (x[::-1], mask[::-1]))
    out_b = out_b_rev[::-1]
    out = jnp.concatenate([out_f, out_b], axis=-1).transpose(1, 0, 2)   # [B,T,2H]
    h1 = jnp.tanh(out @ params['w1'] + params['b1'])
    s = h1 @ params['w2'] + params['b2']                                # [B,T,hops]
    a = jax.nn.softmax(s, axis=1)
    A = jnp.transpose(a, (0, 2, 1))                                     # [B,hops,T]
    u = A @ out                                                         # [B,hops,2H]
    pmat = A @ jnp.transpose(A, (0, 2, 1)) - jnp.eye(hops, dtype=jnp.float32)
    p = jnp.sqrt(jnp.sum(pmat ** 2)) * penalty
    return u.reshape(B, -1), p


if __name__ == "__main__":
    key = jax.random.PRNGKey(0)
    vocab, E, H, A_dim, hops = 50, 64, 32, 32, 4
    B, T = 4, 8
    penalty = 1.0

    keys = jax.random.split(key, 12)
    kL = 1.0 / np.sqrt(H)
    k1 = 1.0 / np.sqrt(2 * H)
    k2 = 1.0 / np.sqrt(A_dim)
    params = {
        'embedding': jax.random.normal(keys[0], (vocab, E), jnp.float32),
        'wih_f': jax.random.uniform(keys[1], (E, 4 * H), jnp.float32, -kL, kL),
        'whh_f': jax.random.uniform(keys[2], (H, 4 * H), jnp.float32, -kL, kL),
        'b_f':   jax.random.uniform(keys[3], (1, 4 * H), jnp.float32, -kL, kL),
        'wih_b': jax.random.uniform(keys[4], (E, 4 * H), jnp.float32, -kL, kL),
        'whh_b': jax.random.uniform(keys[5], (H, 4 * H), jnp.float32, -kL, kL),
        'b_b':   jax.random.uniform(keys[6], (1, 4 * H), jnp.float32, -kL, kL),
        'w1': jax.random.uniform(keys[7], (2 * H, A_dim), jnp.float32, -k1, k1),
        'b1': jax.random.uniform(keys[8], (1, A_dim), jnp.float32, -k1, k1),
        'w2': jax.random.uniform(keys[9], (A_dim, hops), jnp.float32, -k2, k2),
        'b2': jax.random.uniform(keys[10], (1, hops), jnp.float32, -k2, k2),
    }
    params['embedding'] = params['embedding'].at[0].set(0.0)   # <pad> row (padding_idx=0)

    lengths = jnp.array([8, 5, 3, 6], dtype=jnp.int32)         # max(lengths) == T
    tok = jax.random.randint(keys[11], (B, T), 1, vocab, dtype=jnp.int32)
    tokens = jnp.where(jnp.arange(T)[None, :] < lengths[:, None], tok, 0)

    u, p = sentence_embedding_encoder_forward(tokens, lengths, params, penalty, hops)
    u = jax.block_until_ready(u)
    p = jax.block_until_ready(p)

    u_ref, p_ref = reference_forward(tokens, lengths, params, penalty, hops)
    assert u.shape == (B, 2 * H * hops)
    np.testing.assert_allclose(np.asarray(u), np.asarray(u_ref), rtol=2e-3, atol=2e-3)
    np.testing.assert_allclose(float(p), float(p_ref), rtol=2e-3, atol=2e-3)
    print("KERNEL_OK")
</pallas_src>

<mosaic_0001>
module attributes {stable_mosaic.version = 11 : i64} {
  func.func @_gemm_bias_kernel(%arg0: i32, %arg1: memref<32x64xf32, #tpu.memory_space<vmem>>, %arg2: memref<64x256xf32, #tpu.memory_space<vmem>>, %arg3: memref<1x256xf32, #tpu.memory_space<vmem>>, %arg4: memref<32x256xf32, #tpu.memory_space<vmem>>) attributes {dimension_semantics = [#tpu.dimension_semantics<parallel>], iteration_bounds = array<i64: 1>, scalar_prefetch = 0 : i64, scratch_operands = 0 : i64, tpu.core_type = #tpu.core_type<tc>, window_params = [{transform_indices = @transform_0, window_bounds = array<i64: 32, 64>}, {pipeline_mode = #tpu.pipeline_mode<synchronous>, transform_indices = @transform_1, window_bounds = array<i64: 64, 256>}, {pipeline_mode = #tpu.pipeline_mode<synchronous>, transform_indices = @transform_2, window_bounds = array<i64: 1, 256>}, {transform_indices = @transform_3, window_bounds = array<i64: 32, 256>}]} {
    %c0 = arith.constant 0 : index
    %c0_0 = arith.constant 0 : index
    %0 = vector.load %arg1[%c0, %c0_0] : memref<32x64xf32, #tpu.memory_space<vmem>>, vector<32x64xf32>
    %c0_1 = arith.constant 0 : index
    %c0_2 = arith.constant 0 : index
    %1 = vector.load %arg2[%c0_1, %c0_2] : memref<64x256xf32, #tpu.memory_space<vmem>>, vector<64x256xf32>
    %cst = arith.constant dense<0.000000e+00> : vector<32x256xf32>
    %2 = tpu.matmul %0, %1, %cst {dimension_numbers = #tpu.dot_dimension_numbers<[1], [0], [0], [1], [0, 0, 1, 1], [], []>} : vector<32x64xf32>, vector<64x256xf32>, vector<32x256xf32> -> vector<32x256xf32>
    %c0_3 = arith.constant 0 : index
    %c0_4 = arith.constant 0 : index
    %3 = vector.load %arg3[%c0_3, %c0_4] : memref<1x256xf32, #tpu.memory_space<vmem>>, vector<1x256xf32>
    %4 = vector.broadcast %3 : vector<1x256xf32> to vector<32x256xf32>
    %5 = arith.addf %2, %4 : vector<32x256xf32>
    %c0_5 = arith.constant 0 : index
    %c0_6 = arith.constant 0 : index
    %6 = vector.load %arg4[%c0_5, %c0_6] : memref<32x256xf32, #tpu.memory_space<vmem>>, vector<32x256xf32>
    tpu.vector_store %arg4[%c0_5, %c0_6], %5 {strides = array<i32>} : memref<32x256xf32, #tpu.memory_space<vmem>>, vector<32x256xf32>,
    return
  }
  func.func @transform_0(%arg0: i32) -> (i32, i32) {
    %c0_i32 = arith.constant 0 : i32
    %c0_i32_0 = arith.constant 0 : i32
    return %arg0, %c0_i32 : i32, i32
  }
  func.func @transform_1(%arg0: i32) -> (i32, i32) {
    %c0_i32 = arith.constant 0 : i32
    %c0_i32_0 = arith.constant 0 : i32
    %c0_i32_1 = arith.constant 0 : i32
    return %c0_i32, %c0_i32_0 : i32, i32
  }
  func.func @transform_2(%arg0: i32) -> (i32, i32) {
    %c0_i32 = arith.constant 0 : i32
    %c0_i32_0 = arith.constant 0 : i32
    %c0_i32_1 = arith.constant 0 : i32
    return %c0_i32, %c0_i32_0 : i32, i32
  }
  func.func @transform_3(%arg0: i32) -> (i32, i32) {
    %c0_i32 = arith.constant 0 : i32
    %c0_i32_0 = arith.constant 0 : i32
    return %arg0, %c0_i32 : i32, i32
  }
}

</mosaic_0001>

<bundles_post_ra>
// kernel: tpu_custom_call.1
= control target key start
LH: loop header
LB: loop body
LE: loop exit
PB: predicated region body
PF: predicated region fallthrough
CT: control target
= control target key end

     0   :  { %8 = vsyncpa [#allocation3], 0  ;;  %s343_s0 = inlined_call_operand.hbm [shape: f32[32,64], index: 0, kind: input, shape index: {}]   ;;  %s344_s1 = inlined_call_operand.hbm [shape: f32[64,256], index: 1, kind: input, shape index: {}]   ;;  %s345_s2 = inlined_call_operand.vmem [shape: f32[1,256], index: 2, kind: input, shape index: {}]   ;;  %s346_s3 = inlined_call_operand.hbm [shape: f32[32,256], index: 3, kind: output, shape index: {}]  }
   0x1   :  { %9 = vsyncpa [#allocation6], 0 }
   0x2   :  { %10 = vsyncpa [#allocation4], 0  ;;  %s297_s12 = smov [#allocation2]  }
   0x3   :  { %s16_s13 = sshll.u32 %s297_s12, 4  ;;  %s17_s13 = int_to_ptr.vmem [resolvable:$true] %s16_s13 }
   0x4   :  { %s239_s14 = scalar_lea.vmem %s17_s13, 512  ;;  %p244_p1 = scmp.lt.s32.totalorder %s17_s13, %s17_s13 }
   0x5   :  { %p240_p0 = scmp.ne.s32.totalorder %s17_s13, %s239_s14  ;;  %p245_p2 = scmp.lt.s32.totalorder %s239_s14, %s239_s14 }
   0x7   :  { %p246_p3 = por %p245_p2, %p244_p1 }
   0x9   :  { %p247_p4 = pnand %p246_p3, %p240_p0 }
   0xb   :  { %250 = shalt.err (!%p247_p4)
}
   0xc   :  { %s298_s15 = smov 128   ;;  %s299_s16 = smov 8  }
   0xd   :  { %22 = dma.hbm_to_vmem [thread:$0]  %s343_s0, 512, %s17_s13, [#allocation3], %s298_s15, %s298_s15, %s299_s16  }
   0xe   :  { %s300_s19 = smov [#allocation5]  }
   0xf   :  { %s28_s20 = sshll.u32 %s300_s19, 4  ;;  %s29_s20 = int_to_ptr.vmem [resolvable:$true] %s28_s20 }
  0x10   :  { %s259_s21 = scalar_lea.vmem %s29_s20, 2048  ;;  %p264_p6 = scmp.lt.s32.totalorder %s29_s20, %s29_s20 }
  0x11   :  { %p260_p5 = scmp.ne.s32.totalorder %s29_s20, %s259_s21  ;;  %p265_p7 = scmp.lt.s32.totalorder %s259_s21, %s259_s21 }
  0x13   :  { %p266_p8 = por %p265_p7, %p264_p6 }
  0x15   :  { %p267_p9 = pnand %p266_p8, %p260_p5 }
  0x17   :  { %270 = shalt.err (!%p267_p9)
}
  0x18   :  { %s301_s22 = smov 256   ;;  %s302_s23 = smov 16  }
  0x19   :  { %34 = dma.hbm_to_vmem [thread:$0]  %s344_s1, 2048, %s29_s20, [#allocation6], %s301_s22, %s301_s22, %s302_s23  }
  0x1a   :  { %291 = dma.done.wait [#allocation3], 512  }
  0x1b   :  { %292 = vsyncadd [#allocation3], 4294966784 }
  0x1c   :  { %293 = dma.done.wait [#allocation6], 2048  }
  0x1d   :  { %294 = vsyncadd [#allocation6], 4294965248  ;;  %v303_v0 = vmov 0.0   ;;  %v62_v1 = vld [vmem:[#allocation5 + $0x78] sm:$0xff]  ;;  %v61_v2 = vld [vmem:[#allocation5 + $0x70] sm:$0xff]  ;;  %vm75_vm0 = vcmask 523264   ;;  %v65_v21 = vlaneseq }
  0x1e   :  { %152 = vmatprep.mubr.f32.mxu0 %v303_v0  ;;  %164 = vmatprep.mubr.f32.mxu1 %v303_v0  ;;  %v60_v3 = vld [vmem:[#allocation5 + $0x68] sm:$0xff]  ;;  %v59_v4 = vld [vmem:[#allocation5 + $0x60] sm:$0xff]  ;;  %v58_v5 = vld [vmem:[#allocation5 + $0x58] sm:$0xff]  ;;  %s304_s26 = smov [#allocation7]  }
  0x1f   :  { %104 = vmatprep.subr.mxu0 %v62_v1  ;;  %207 = vmatprep.subr.mxu1 %v62_v1  ;;  %v57_v6 = vld [vmem:[#allocation5 + $0x50] sm:$0xff]  ;;  %v56_v7 = vld [vmem:[#allocation5 + $0x48] sm:$0xff]  ;;  %v55_v8 = vld [vmem:[#allocation5 + $0x40] sm:$0xff]  ;;  %v66_v22 = vshrl.u32 %v65_v21, 7  ;;  %s190_s27 = sshll.u32 %s304_s26, 4  ;;  %s191_s27 = int_to_ptr.vmem [resolvable:$true] %s190_s27 }
  0x20   :  { %105 = vmatpush1.msra.mxu0 %v61_v2  ;;  %215 = vmatpush1.msra.mxu1 %v61_v2  ;;  %v54_v9 = vld [vmem:[#allocation5 + $0x38] sm:$0xff]  ;;  %v53_v10 = vld [vmem:[#allocation5 + $0x30] sm:$0xff]  ;;  %v52_v11 = vld [vmem:[#allocation5 + $0x28] sm:$0xff]  ;;  %p276_p11 = scmp.lt.s32.totalorder %s191_s27, %s191_s27 }
  0x21   :  { %106 = vmatprep.subr.mxu0 %v60_v3  ;;  %208 = vmatprep.subr.mxu1 %v60_v3  ;;  %v51_v12 = vld [vmem:[#allocation5 + $0x20] sm:$0xff]  ;;  %v50_v13 = vld [vmem:[#allocation5 + $0x18] sm:$0xff]  ;;  %v49_v14 = vld [vmem:[#allocation5 + $0x10] sm:$0xff]  ;;  %v67_v23 = vsub.s32 0, %v66_v22  ;;  %v71_v25 = vsub.s32 1, %v66_v22 }
  0x22   :  { %107 = vmatpush1.msra.mxu0 %v59_v4  ;;  %216 = vmatpush1.msra.mxu1 %v59_v4  ;;  %v48_v15 = vld [vmem:[#allocation5 + $0x8] sm:$0xff]  ;;  %v47_v16 = vld [vmem:[#allocation5] sm:$0xff]  ;;  %v45_v18 = vld [vmem:[#allocation2 + $0x10] sm:$0xff] }
  0x23   :  { %108 = vmatprep.subr.mxu0 %v58_v5  ;;  %209 = vmatprep.subr.mxu1 %v58_v5  ;;  %v43_v17 = vld [vmem:[#allocation2] sm:$0xff]  ;;  %v44_v19 = vld [vmem:[#allocation2 + $0x8] sm:$0xff]  ;;  %v46_v20 = vld [vmem:[#allocation2 + $0x18] sm:$0xff] }
  0x24   :  { %109 = vmatpush1.msra.mxu0 %v57_v6  ;;  %217 = vmatpush1.msra.mxu1 %v57_v6  ;;  %v63_v24 = vld [vmem:[%s345_s2] sm:$0x3]  ;;  %s271_s2 = scalar_lea.vmem %s191_s27, 1024 }
  0x25   :  { %110 = vmatprep.subr.mxu0 %v56_v7  ;;  %210 = vmatprep.subr.mxu1 %v56_v7  ;;  %v68_v26 = vrot.slane %v63_v24, %v67_v23  ;;  %v72_v27 = vrot.slane %v63_v24, %v71_v25  ;;  %p272_p10 = scmp.ne.s32.totalorder %s191_s27, %s271_s2  ;;  %p277_p12 = scmp.lt.s32.totalorder %s271_s2, %s271_s2 }
  0x26   :  { %111 = vmatpush1.msra.mxu0 %v55_v8  ;;  %218 = vmatpush1.msra.mxu1 %v55_v8 }
  0x27   :  { %112 = vmatprep.subr.mxu0 %v54_v9  ;;  %211 = vmatprep.subr.mxu1 %v54_v9  ;;  %p278_p13 = por %p277_p12, %p276_p11 }
  0x28   :  { %113 = vmatpush1.msra.mxu0 %v53_v10  ;;  %219 = vmatpush1.msra.mxu1 %v53_v10 }
  0x29   :  { %114 = vmatprep.subr.mxu0 %v52_v11  ;;  %212 = vmatprep.subr.mxu1 %v52_v11  ;;  %p279_p0 = pnand %p278_p13, %p272_p10 }
  0x2a   :  { %115 = vmatpush1.msra.mxu0 %v51_v12  ;;  %220 = vmatpush1.msra.mxu1 %v51_v12 }
  0x2b   :  { %116 = vmatprep.subr.mxu0 %v50_v13  ;;  %213 = vmatprep.subr.mxu1 %v50_v13 }
  0x2c   :  { %117 = vmatpush1.msra.mxu0 %v49_v14  ;;  %221 = vmatpush1.msra.mxu1 %v49_v14 }
  0x2d   :  { %118 = vmatprep.subr.mxu0 %v48_v15  ;;  %214 = vmatprep.subr.mxu1 %v48_v15 }
  0x2e   :  { %119 = vmatpush1.msra.mxu0 %v47_v16  ;;  %222 = vmatpush1.msra.mxu1 %v47_v16 }
  0x2f   :  { %203 = vmatmul.mubr.msk.f32.vlgmr.msra.gmra.mxu0 %vm75_vm0, %v43_v17  ;;  %205 = vmatmul.mubr.msk.f32.vlgmr.msra.gmra.mxu1 %vm75_vm0, %v45_v18 }
  0x30   :  { %158 = vmatprep.mubr.f32.mxu0 %v303_v0  ;;  %170 = vmatprep.mubr.f32.mxu1 %v303_v0 }
  0x33   :  { %204 = vmatmul.mubr.msk.f32.gmra.mxu0 %vm75_vm0, %v44_v19  ;;  %206 = vmatmul.mubr.msk.f32.gmra.mxu1 %vm75_vm0, %v46_v20 }
  0xef   :  { %v154_v28 = vpop.f32.mrf.mxu0  ;;  %v166_v29 = vpop.f32.mrf.mxu1 }
  0xf0   :  { %v155_v30 = vadd.f32 %v154_v28, %v68_v26  ;;  %v167_v31 = vadd.f32 %v166_v29, %v68_v26 }
  0xf1   :  { %v156_v32 = vpop.f32.mrf.mxu0  ;;  %v168_v33 = vpop.f32.mrf.mxu1 }
  0xf2   :  { %177 = vst [vmem:[#allocation7] sm:$0xff] %v155_v30  ;;  %181 = vst [vmem:[#allocation7 + $0x20] sm:$0xff] %v167_v31  ;;  %v157_v34 = vadd.f32 %v156_v32, %v72_v27  ;;  %v169_v35 = vadd.f32 %v168_v33, %v72_v27 }
  0xf3   :  { %v160_v36 = vpop.f32.mrf.mxu0  ;;  %v172_v37 = vpop.f32.mrf.mxu1 }
  0xf4   :  { %178 = vst [vmem:[#allocation7 + $0x8] sm:$0xff] %v157_v34  ;;  %182 = vst [vmem:[#allocation7 + $0x28] sm:$0xff] %v169_v35  ;;  %v161_v38 = vadd.f32 %v160_v36, %v68_v26  ;;  %v173_v39 = vadd.f32 %v172_v37, %v68_v26 }
  0xf5   :  { %v162_v40 = vpop.f32.mrf.mxu0  ;;  %v174_v41 = vpop.f32.mrf.mxu1 }
  0xf6   :  { %179 = vst [vmem:[#allocation7 + $0x10] sm:$0xff] %v161_v38  ;;  %183 = vst [vmem:[#allocation7 + $0x30] sm:$0xff] %v173_v39  ;;  %v163_v42 = vadd.f32 %v162_v40, %v72_v27  ;;  %v175_v43 = vadd.f32 %v174_v41, %v72_v27 }
  0xf8   :  { %180 = vst [vmem:[#allocation7 + $0x18] sm:$0xff] %v163_v42  ;;  %184 = vst [vmem:[#allocation7 + $0x38] sm:$0xff] %v175_v43 }
  0xf9   :  { %282 = shalt.err (!%p279_p0)
}
  0xfa   :  { %196 = dma.vmem_to_hbm [thread:$0]  %s191_s27, 1024, %s346_s3, [#allocation4], %s301_s22, %s301_s22, %s302_s23  }
  0xfb   :  { %295 = dma.done.wait [#allocation4], 1024  }
  0xfc   :  { %296 = vsyncadd [#allocation4], 4294966272 }
  0xfd   :  { %200 = vsyncpa [#allocation3], 1 }
  0xfe   :  { %201 = vsyncpa [#allocation6], 1 }
  0xff   :  { %202 = vsyncpa [#allocation4], 1 }

</bundles_post_ra>
